<compile_context>
chip_gen: v5e
topology: v5e:2x2
jax: 0.10.0
libtpu: 0.0.40
codegen_flags: <defaults>
</compile_context>

<pallas_src>
import functools

import jax
import jax.numpy as jnp
from jax.experimental import pallas as pl
from jax.experimental.pallas import tpu as pltpu


def _round_up(n, m):
    return ((n + m - 1) // m) * m


def coupling_kernel(x_ref, mask_ref, w1_ref, b1_ref, w2s_ref, b2s_ref,
                    w2t_ref, b2t_ref, z_ref, ld_ref, *, hp):
    """One (tb, D) batch tile of the coupling layer.

    x_ref   : (tb, D)    f32   streamed over the batch grid
    mask_ref: (1, D)     f32   VMEM resident
    w1_ref  : (D, 2*hp)  bf16  fused [W1s | W1t] (hidden zero-padded to hp)
    b1_ref  : (1, 2*hp)  f32
    w2s_ref : (hp, D)    bf16
    b2s_ref : (1, D)     f32
    w2t_ref : (hp, D)    bf16
    b2t_ref : (1, D)     f32
    z_ref   : (tb, D)    f32
    ld_ref  : (tb, 1)    f32
    """
    x = x_ref[...]
    b = mask_ref[...]
    one_minus_b = 1.0 - b
    bx = b * x                                    # masked input fed to both nets

    # Fused first layer (single MXU push): [h_s | h_t] = (b*x) @ [W1s | W1t] + [b1s | b1t]
    # Matmul operands in bf16 (MXU-native on v5e/v6e/v7x), f32 accumulation.
    h = (jnp.dot(bx.astype(jnp.bfloat16), w1_ref[...],
                 preferred_element_type=jnp.float32) + b1_ref[...])      # (tb, 2*hp)

    # hp is a multiple of 128, so both slices are lane-aligned (no relayout).
    hs = jnp.tanh(h[:, :hp]).astype(jnp.bfloat16)           # scale branch
    ht = jnp.maximum(h[:, hp:], 0.0).astype(jnp.bfloat16)   # translation branch

    # Second layer: two half-size pushes (no block-diagonal zeros, no concat).
    s = (jnp.dot(hs, w2s_ref[...], preferred_element_type=jnp.float32)
         + b2s_ref[...])                                     # (tb, D) f32
    t = (jnp.dot(ht, w2t_ref[...], preferred_element_type=jnp.float32)
         + b2t_ref[...])                                     # (tb, D) f32

    # z = b*x + (1-b) * (x * exp(s) + t).  Like the PyTorch reference, exp(s)
    # is also evaluated on masked (b=1) lanes where it is multiplied by 0.
    z_ref[...] = bx + one_minus_b * (x * jnp.exp(s) + t)

    # log|det J| = sum_i (1-b_i) * s_i   (per-row reduce; tiny (tb,1) store)
    ld_ref[...] = jnp.sum(one_minus_b * s, axis=1, keepdims=True)


def pack_params(params, feature_dim, hidden_dim):
    """One-time fusion + hidden-dim padding + bf16 cast of the MLP parameters.

    Only the hidden dim is padded (to a multiple of 128) so the in-kernel split
    of the fused first-layer output is lane-aligned; the feature dim is left
    untouched so streamed x/z HBM traffic is not inflated.

    Zero padding of the hidden dim is exact by construction: padded hidden
    units get zero incoming weights and zero bias (tanh(0)=0, relu(0)=0) and
    zero rows in W2s/W2t, so they contribute nothing to s, t, z or log-det.
    """
    D, H = feature_dim, hidden_dim
    hp = max(128, _round_up(H, 128))

    def pad_cols(w):   # (r, H) -> (r, hp)
        return jnp.pad(w, ((0, 0), (0, hp - H)))

    def pad_rows(w):   # (H, c) -> (hp, c)
        return jnp.pad(w, ((0, hp - H), (0, 0)))

    w1 = jnp.concatenate([pad_cols(params["w1s"]), pad_cols(params["w1t"])], axis=1)
    b1 = jnp.concatenate([pad_cols(params["b1s"]), pad_cols(params["b1t"])], axis=1)
    return {
        "w1": w1.astype(jnp.bfloat16),                        # (D, 2*hp) MXU operand
        "b1": b1.astype(jnp.float32),                         # (1, 2*hp) f32 add
        "w2s": pad_rows(params["w2s"]).astype(jnp.bfloat16),  # (hp, D)
        "b2s": params["b2s"].astype(jnp.float32),             # (1, D)
        "w2t": pad_rows(params["w2t"]).astype(jnp.bfloat16),  # (hp, D)
        "b2t": params["b2t"].astype(jnp.float32),             # (1, D)
    }


def _pick_batch_tile(batch, feature_dim):
    """~2 MiB of f32 x-rows per grid step (HBM-efficient), multiple of 8,
    capped at 1024 rows, and split into >=2 steps whenever the batch allows so
    the 'parallel' batch axis can shard across v7x's two TensorCores."""
    tb = max(8, min(1024, (2 << 20) // (4 * max(feature_dim, 1))))
    tb -= tb % 8
    if batch > 8:
        tb = min(tb, max(8, _round_up(pl.cdiv(batch, 2), 8)))
    if batch <= tb:
        tb = batch   # full-extent second-to-last dim is always layout-legal
    return tb


def masked_coupling_forward(x, mask, packed):
    """x: (B, D) f32, mask: (D,) f32, packed: output of pack_params."""
    B, D = x.shape
    hp = packed["w2s"].shape[0]
    tb = _pick_batch_tile(B, D)
    grid = (pl.cdiv(B, tb),)

    kernel = functools.partial(coupling_kernel, hp=hp)

    # Weights / mask live whole-array in VMEM for the entire grid:
    # one copy, no per-step DMA, no double-buffering.
    resident = pl.BlockSpec(memory_space=pltpu.MemorySpace.VMEM)

    # VMEM budget: single-copy resident params + double-buffered x/z/ld tiles.
    param_bytes = sum(int(v.size) * v.dtype.itemsize for v in packed.values()) + 4 * D
    stream_bytes = 2 * (2 * tb * D * 4 + tb * 4)
    vmem_limit = int(min(64 << 20, max(32 << 20, 2 * (param_bytes + stream_bytes))))

    z, ld = pl.pallas_call(
        kernel,
        out_shape=(
            jax.ShapeDtypeStruct((B, D), jnp.float32),
            jax.ShapeDtypeStruct((B, 1), jnp.float32),
        ),
        grid=grid,
        in_specs=[
            pl.BlockSpec((tb, D), lambda i: (i, 0)),   # x (streamed, un-padded)
            resident,                                   # mask
            resident,                                   # W1  (bf16)
            resident,                                   # b1
            resident,                                   # W2s (bf16)
            resident,                                   # b2s
            resident,                                   # W2t (bf16)
            resident,                                   # b2t
        ],
        out_specs=(
            pl.BlockSpec((tb, D), lambda i: (i, 0)),   # z (un-padded: no wrapper slice)
            pl.BlockSpec((tb, 1), lambda i: (i, 0)),   # sum_log_det_J
        ),
        compiler_params=pltpu.CompilerParams(
            dimension_semantics=("parallel",),
            vmem_limit_bytes=vmem_limit,
        ),
    )(x, mask.reshape(1, D), packed["w1"], packed["b1"],
      packed["w2s"], packed["b2s"], packed["w2t"], packed["b2t"])

    return z, ld.reshape(B)


def init_params(key, feature_dim, hidden_dim):
    ks = jax.random.split(key, 8)
    scale = 0.1
    return {
        "w1s": scale * jax.random.normal(ks[0], (feature_dim, hidden_dim), jnp.float32),
        "b1s": scale * jax.random.normal(ks[1], (1, hidden_dim), jnp.float32),
        "w2s": scale * jax.random.normal(ks[2], (hidden_dim, feature_dim), jnp.float32),
        "b2s": scale * jax.random.normal(ks[3], (1, feature_dim), jnp.float32),
        "w1t": scale * jax.random.normal(ks[4], (feature_dim, hidden_dim), jnp.float32),
        "b1t": scale * jax.random.normal(ks[5], (1, hidden_dim), jnp.float32),
        "w2t": scale * jax.random.normal(ks[6], (hidden_dim, feature_dim), jnp.float32),
        "b2t": scale * jax.random.normal(ks[7], (1, feature_dim), jnp.float32),
    }


def reference_forward(x, mask, p):
    """Pure-JAX f32 reference matching the PyTorch module semantics."""
    b = mask.reshape(1, -1)
    bx = b * x
    s = jnp.tanh(bx @ p["w1s"] + p["b1s"]) @ p["w2s"] + p["b2s"]
    t = jnp.maximum(bx @ p["w1t"] + p["b1t"], 0.0) @ p["w2t"] + p["b2t"]
    z = b * x + (1 - b) * (x * jnp.exp(s) + t)
    ld = jnp.sum((1 - b) * s, axis=1)
    return z, ld


# TODO(synk): inverse() transformation of the module is not implemented (only
# the forward pass was requested).

if __name__ == "__main__":
    key = jax.random.PRNGKey(0)
    k_x, k_p = jax.random.split(key)

    batch, feature_dim, hidden_dim = 8, 16, 32
    x = jax.random.normal(k_x, (batch, feature_dim), jnp.float32)
    # checkerboard binary mask over features
    mask = (jnp.arange(feature_dim) % 2).astype(jnp.float32)
    params = init_params(k_p, feature_dim, hidden_dim)

    packed = pack_params(params, feature_dim, hidden_dim)   # one-time fuse/pad/bf16

    z, sum_log_det_J = masked_coupling_forward(x, mask, packed)
    jax.block_until_ready((z, sum_log_det_J))

    z_ref, ld_ref = reference_forward(x, mask, params)
    # bf16 MXU operands vs. f32 reference -> loosened tolerances (per review).
    assert jnp.allclose(z, z_ref, atol=5e-2, rtol=5e-2), \
        float(jnp.max(jnp.abs(z - z_ref)))
    assert jnp.allclose(sum_log_det_J, ld_ref, atol=5e-2, rtol=5e-2), \
        float(jnp.max(jnp.abs(sum_log_det_J - ld_ref)))

    print("KERNEL_OK")
</pallas_src>

<mosaic_0001>
module attributes {stable_mosaic.version = 11 : i64} {
  func.func @coupling_kernel(%arg0: i32, %arg1: memref<8x16xf32, #tpu.memory_space<vmem>>, %arg2: memref<1x16xf32, #tpu.memory_space<vmem>>, %arg3: memref<16x256xbf16, #tpu.memory_space<vmem>>, %arg4: memref<1x256xf32, #tpu.memory_space<vmem>>, %arg5: memref<128x16xbf16, #tpu.memory_space<vmem>>, %arg6: memref<1x16xf32, #tpu.memory_space<vmem>>, %arg7: memref<128x16xbf16, #tpu.memory_space<vmem>>, %arg8: memref<1x16xf32, #tpu.memory_space<vmem>>, %arg9: memref<8x16xf32, #tpu.memory_space<vmem>>, %arg10: memref<8x1xf32, #tpu.memory_space<vmem>>) attributes {dimension_semantics = [#tpu.dimension_semantics<parallel>], iteration_bounds = array<i64: 1>, scalar_prefetch = 0 : i64, scratch_operands = 0 : i64, tpu.core_type = #tpu.core_type<tc>, window_params = [{transform_indices = @transform_0, window_bounds = array<i64: 8, 16>}, {pipeline_mode = #tpu.pipeline_mode<synchronous>, transform_indices = @transform_1, window_bounds = array<i64: 1, 16>}, {pipeline_mode = #tpu.pipeline_mode<synchronous>, transform_indices = @transform_2, window_bounds = array<i64: 16, 256>}, {pipeline_mode = #tpu.pipeline_mode<synchronous>, transform_indices = @transform_3, window_bounds = array<i64: 1, 256>}, {pipeline_mode = #tpu.pipeline_mode<synchronous>, transform_indices = @transform_4, window_bounds = array<i64: 128, 16>}, {pipeline_mode = #tpu.pipeline_mode<synchronous>, transform_indices = @transform_5, window_bounds = array<i64: 1, 16>}, {pipeline_mode = #tpu.pipeline_mode<synchronous>, transform_indices = @transform_6, window_bounds = array<i64: 128, 16>}, {pipeline_mode = #tpu.pipeline_mode<synchronous>, transform_indices = @transform_7, window_bounds = array<i64: 1, 16>}, {transform_indices = @transform_8, window_bounds = array<i64: 8, 16>}, {transform_indices = @transform_9, window_bounds = array<i64: 8, 1>}]} {
    %c0 = arith.constant 0 : index
    %c0_0 = arith.constant 0 : index
    %0 = vector.load %arg1[%c0, %c0_0] : memref<8x16xf32, #tpu.memory_space<vmem>>, vector<8x16xf32>
    %c0_1 = arith.constant 0 : index
    %c0_2 = arith.constant 0 : index
    %1 = vector.load %arg2[%c0_1, %c0_2] : memref<1x16xf32, #tpu.memory_space<vmem>>, vector<1x16xf32>
    %cst = arith.constant 1.000000e+00 : f32
    %2 = vector.broadcast %cst : f32 to vector<1x16xf32>
    %3 = arith.subf %2, %1 : vector<1x16xf32>
    %4 = vector.broadcast %1 : vector<1x16xf32> to vector<8x16xf32>
    %5 = arith.mulf %4, %0 : vector<8x16xf32>
    %6 = arith.truncf %5 : vector<8x16xf32> to vector<8x16xbf16>
    %c0_3 = arith.constant 0 : index
    %c0_4 = arith.constant 0 : index
    %7 = vector.load %arg3[%c0_3, %c0_4] : memref<16x256xbf16, #tpu.memory_space<vmem>>, vector<16x256xbf16>
    %cst_5 = arith.constant dense<0.000000e+00> : vector<8x256xf32>
    %8 = tpu.matmul %6, %7, %cst_5 {dimension_numbers = #tpu.dot_dimension_numbers<[1], [0], [0], [1], [0, 0, 1, 1], [], []>} : vector<8x16xbf16>, vector<16x256xbf16>, vector<8x256xf32> -> vector<8x256xf32>
    %c0_6 = arith.constant 0 : index
    %c0_7 = arith.constant 0 : index
    %9 = vector.load %arg4[%c0_6, %c0_7] : memref<1x256xf32, #tpu.memory_space<vmem>>, vector<1x256xf32>
    %10 = vector.broadcast %9 : vector<1x256xf32> to vector<8x256xf32>
    %11 = arith.addf %8, %10 : vector<8x256xf32>
    %12 = vector.extract_strided_slice %11 {offsets = [0, 0], sizes = [8, 128], strides = [1, 1]} : vector<8x256xf32> to vector<8x128xf32>
    %13 = math.tanh %12 : vector<8x128xf32>
    %14 = arith.truncf %13 : vector<8x128xf32> to vector<8x128xbf16>
    %15 = vector.extract_strided_slice %11 {offsets = [0, 128], sizes = [8, 128], strides = [1, 1]} : vector<8x256xf32> to vector<8x128xf32>
    %cst_8 = arith.constant 0.000000e+00 : f32
    %16 = vector.broadcast %cst_8 : f32 to vector<8x128xf32>
    %17 = arith.maximumf %15, %16 : vector<8x128xf32>
    %18 = arith.truncf %17 : vector<8x128xf32> to vector<8x128xbf16>
    %c0_9 = arith.constant 0 : index
    %c0_10 = arith.constant 0 : index
    %19 = vector.load %arg5[%c0_9, %c0_10] : memref<128x16xbf16, #tpu.memory_space<vmem>>, vector<128x16xbf16>
    %cst_11 = arith.constant dense<0.000000e+00> : vector<8x16xf32>
    %20 = tpu.matmul %14, %19, %cst_11 {dimension_numbers = #tpu.dot_dimension_numbers<[1], [0], [0], [1], [0, 0, 1, 1], [], []>} : vector<8x128xbf16>, vector<128x16xbf16>, vector<8x16xf32> -> vector<8x16xf32>
    %c0_12 = arith.constant 0 : index
    %c0_13 = arith.constant 0 : index
    %21 = vector.load %arg6[%c0_12, %c0_13] : memref<1x16xf32, #tpu.memory_space<vmem>>, vector<1x16xf32>
    %22 = vector.broadcast %21 : vector<1x16xf32> to vector<8x16xf32>
    %23 = arith.addf %20, %22 : vector<8x16xf32>
    %c0_14 = arith.constant 0 : index
    %c0_15 = arith.constant 0 : index
    %24 = vector.load %arg7[%c0_14, %c0_15] : memref<128x16xbf16, #tpu.memory_space<vmem>>, vector<128x16xbf16>
    %cst_16 = arith.constant dense<0.000000e+00> : vector<8x16xf32>
    %25 = tpu.matmul %18, %24, %cst_16 {dimension_numbers = #tpu.dot_dimension_numbers<[1], [0], [0], [1], [0, 0, 1, 1], [], []>} : vector<8x128xbf16>, vector<128x16xbf16>, vector<8x16xf32> -> vector<8x16xf32>
    %c0_17 = arith.constant 0 : index
    %c0_18 = arith.constant 0 : index
    %26 = vector.load %arg8[%c0_17, %c0_18] : memref<1x16xf32, #tpu.memory_space<vmem>>, vector<1x16xf32>
    %27 = vector.broadcast %26 : vector<1x16xf32> to vector<8x16xf32>
    %28 = arith.addf %25, %27 : vector<8x16xf32>
    %29 = math.exp %23 : vector<8x16xf32>
    %30 = arith.mulf %0, %29 : vector<8x16xf32>
    %31 = arith.addf %30, %28 : vector<8x16xf32>
    %32 = vector.broadcast %3 : vector<1x16xf32> to vector<8x16xf32>
    %33 = arith.mulf %32, %31 : vector<8x16xf32>
    %34 = arith.addf %5, %33 : vector<8x16xf32>
    %c0_19 = arith.constant 0 : index
    %c0_20 = arith.constant 0 : index
    %35 = vector.load %arg9[%c0_19, %c0_20] : memref<8x16xf32, #tpu.memory_space<vmem>>, vector<8x16xf32>
    tpu.vector_store %arg9[%c0_19, %c0_20], %34 {strides = array<i32>} : memref<8x16xf32, #tpu.memory_space<vmem>>, vector<8x16xf32>,
    %36 = vector.broadcast %3 : vector<1x16xf32> to vector<8x16xf32>
    %37 = arith.mulf %36, %23 : vector<8x16xf32>
    %cst_21 = arith.constant dense<0.000000e+00> : vector<8xf32>
    %38 = vector.multi_reduction <add>, %37, %cst_21 [1] : vector<8x16xf32> to vector<8xf32>
    %39 = vector.shape_cast %38 : vector<8xf32> to vector<8x1xf32>
    %c0_22 = arith.constant 0 : index
    %c0_23 = arith.constant 0 : index
    %40 = vector.load %arg10[%c0_22, %c0_23] : memref<8x1xf32, #tpu.memory_space<vmem>>, vector<8x1xf32>
    tpu.vector_store %arg10[%c0_22, %c0_23], %39 {strides = array<i32>} : memref<8x1xf32, #tpu.memory_space<vmem>>, vector<8x1xf32>,
    return
  }
  func.func @transform_0(%arg0: i32) -> (i32, i32) {
    %c0_i32 = arith.constant 0 : i32
    %c0_i32_0 = arith.constant 0 : i32
    return %arg0, %c0_i32 : i32, i32
  }
  func.func @transform_1(%arg0: i32) -> (i32, i32) {
    %c0_i32 = arith.constant 0 : i32
    %c0_i32_0 = arith.constant 0 : i32
    %c0_i32_1 = arith.constant 0 : i32
    return %c0_i32, %c0_i32_0 : i32, i32
  }
  func.func @transform_2(%arg0: i32) -> (i32, i32) {
    %c0_i32 = arith.constant 0 : i32
    %c0_i32_0 = arith.constant 0 : i32
    %c0_i32_1 = arith.constant 0 : i32
    return %c0_i32, %c0_i32_0 : i32, i32
  }
  func.func @transform_3(%arg0: i32) -> (i32, i32) {
    %c0_i32 = arith.constant 0 : i32
    %c0_i32_0 = arith.constant 0 : i32
    %c0_i32_1 = arith.constant 0 : i32
    return %c0_i32, %c0_i32_0 : i32, i32
  }
  func.func @transform_4(%arg0: i32) -> (i32, i32) {
    %c0_i32 = arith.constant 0 : i32
    %c0_i32_0 = arith.constant 0 : i32
    %c0_i32_1 = arith.constant 0 : i32
    return %c0_i32, %c0_i32_0 : i32, i32
  }
  func.func @transform_5(%arg0: i32) -> (i32, i32) {
    %c0_i32 = arith.constant 0 : i32
    %c0_i32_0 = arith.constant 0 : i32
    %c0_i32_1 = arith.constant 0 : i32
    return %c0_i32, %c0_i32_0 : i32, i32
  }
  func.func @transform_6(%arg0: i32) -> (i32, i32) {
    %c0_i32 = arith.constant 0 : i32
    %c0_i32_0 = arith.constant 0 : i32
    %c0_i32_1 = arith.constant 0 : i32
    return %c0_i32, %c0_i32_0 : i32, i32
  }
  func.func @transform_7(%arg0: i32) -> (i32, i32) {
    %c0_i32 = arith.constant 0 : i32
    %c0_i32_0 = arith.constant 0 : i32
    %c0_i32_1 = arith.constant 0 : i32
    return %c0_i32, %c0_i32_0 : i32, i32
  }
  func.func @transform_8(%arg0: i32) -> (i32, i32) {
    %c0_i32 = arith.constant 0 : i32
    %c0_i32_0 = arith.constant 0 : i32
    return %arg0, %c0_i32 : i32, i32
  }
  func.func @transform_9(%arg0: i32) -> (i32, i32) {
    %c0_i32 = arith.constant 0 : i32
    %c0_i32_0 = arith.constant 0 : i32
    return %arg0, %c0_i32 : i32, i32
  }
}

</mosaic_0001>

<bundles_post_ra>
// kernel: tpu_custom_call.1
= control target key start
LH: loop header
LB: loop body
LE: loop exit
PB: predicated region body
PF: predicated region fallthrough
CT: control target
= control target key end

     0   :  { %vm59_vm0 = vcmask 130048   ;;  %s565_s0 = inlined_call_operand.vmem [shape: f32[8,16], index: 0, kind: input, shape index: {}]   ;;  %s566_s1 = inlined_call_operand.vmem [shape: f32[1,16], index: 1, kind: input, shape index: {}]   ;;  %s567_s2 = inlined_call_operand.vmem [shape: bf16[16,256], index: 2, kind: input, shape index: {}]   ;;  %s568_s3 = inlined_call_operand.vmem [shape: f32[1,256], index: 3, kind: input, shape index: {}]   ;;  %s569_s4 = inlined_call_operand.vmem [shape: bf16[128,16], index: 4, kind: input, shape index: {}]   ;;  %s570_s5 = inlined_call_operand.vmem [shape: f32[1,16], index: 5, kind: input, shape index: {}]   ;;  %s571_s6 = inlined_call_operand.vmem [shape: bf16[128,16], index: 6, kind: input, shape index: {}]   ;;  %s572_s7 = inlined_call_operand.vmem [shape: f32[1,16], index: 7, kind: input, shape index: {}]   ;;  %s573_s8 = inlined_call_operand.hbm [shape: f32[8,16], index: 8, kind: output, shape index: {0}]   ;;  %s574_s9 = inlined_call_operand.vmem [shape: f32[8,1], index: 9, kind: output, shape index: {1}]  }
   0x1   :  { %v293_v0 = vld [vmem:[%s567_s2] sm:$0xf]  ;;  %v366_v1 = vld [vmem:[%s567_s2 + $0x4] sm:$0xf0]  ;;  %v365_v5 = vld [vmem:[%s567_s2 + $0x4] sm:$0xf] }
   0x2   :  { %v477_v2 = vld [vmem:[%s565_s0] sm:$0xff]  ;;  %v294_v3 = vor.u32 %v366_v1, %v293_v0  ;;  %v295_v6 = vld [vmem:[%s567_s2 + $0x8] sm:$0xf0]  ;;  %v374_v7 = vld [vmem:[%s569_s4 + $0x38] sm:$0xff] }
   0x3   :  { %v384_v4 = vld [vmem:[%s566_s1] ss:$0 sm:$0xff]  ;;  %v298_v9 = vor.u32 %v365_v5, %v295_v6  ;;  %v382_v10 = vld [vmem:[%s571_s6 + $0x38] sm:$0xff]  ;;  %161 = vmatpush.bf16.msra.mxu2 %v374_v7  ;;  %v373_v11 = vld [vmem:[%s569_s4 + $0x30] sm:$0xff] }
   0x4   :  { %70 = vmatpush.bf16.msra.mxu0 %v294_v3  ;;  %v492_v8 = vmul.f32 %v384_v4, %v477_v2  ;;  %242 = vmatpush.bf16.msra.mxu3 %v382_v10  ;;  %v381_v13 = vld [vmem:[%s571_s6 + $0x30] sm:$0xff] }
   0x5   :  { %83 = vmatpush.bf16.msra.mxu1 %v298_v9 }
   0x6   :  { %v40_v12 = vpack.c.bf16 %v492_v8, %v492_v8 }
   0x7   :  { %15 = vsyncpa [#allocation3], 0  ;;  %162 = vmatpush.bf16.msra.mxu2 %v373_v11  ;;  %v372_v14 = vld [vmem:[%s569_s4 + $0x28] sm:$0xff]  ;;  %v371_v15 = vld [vmem:[%s569_s4 + $0x20] sm:$0xff]  ;;  %s278_s14 = sshll.u32 %s573_s8, 4  ;;  %vm269_vm1 = vcmask 7168   ;;  %s279_s14 = int_to_ptr.hbm [resolvable:$true] %s278_s14 }
   0x8   :  { %299 = vmatmul.msk.bf16.vlgmr.msra.gmra.mxu0 %vm59_vm0, %v40_v12  ;;  %300 = vmatmul.msk.bf16.vlgmr.msra.gmra.mxu1 %vm59_vm0, %v40_v12  ;;  %v370_v16 = vld [vmem:[%s569_s4 + $0x18] sm:$0xff]  ;;  %v380_v17 = vld [vmem:[%s571_s6 + $0x28] sm:$0xff]  ;;  %v369_v18 = vld [vmem:[%s569_s4 + $0x10] sm:$0xff] }
   0x9   :  { %243 = vmatpush.bf16.msra.mxu3 %v381_v13  ;;  %v379_v19 = vld [vmem:[%s571_s6 + $0x20] sm:$0xff]  ;;  %v368_v20 = vld [vmem:[%s569_s4 + $0x8] sm:$0xff]  ;;  %v378_v21 = vld [vmem:[%s571_s6 + $0x18] sm:$0xff] }
   0xa   :  { %v367_v22 = vld [vmem:[%s569_s4] sm:$0xff]  ;;  %v377_v23 = vld [vmem:[%s571_s6 + $0x10] sm:$0xff]  ;;  %v376_v24 = vld [vmem:[%s571_s6 + $0x8] sm:$0xff] }
   0xb   :  { %163 = vmatpush.bf16.msra.mxu2 %v372_v14  ;;  %v375_v25 = vld [vmem:[%s571_s6] sm:$0xff] }
   0xc   :  { %v43_v26 = vld [vmem:[%s568_s3] sm:$0x3] }
   0xd   :  { %244 = vmatpush.bf16.msra.mxu3 %v380_v17  ;;  %v45_v27 = vperm.slane %v43_v26, 0  ;;  %v46_v28 = vperm.slane %v43_v26, 1  ;;  %v34_v39 = vld [vmem:[%s566_s1] sm:$0x1]  ;;  %s417_s1 = smov [#allocation2]  }
   0xe   :  { %v35_v40 = vsub.f32 1.0, %v34_v39  ;;  %v385_v42 = vld [vmem:[%s570_s5] ss:$0 sm:$0xff]  ;;  %s276_s5 = sshll.u32 %s417_s1, 4  ;;  %s277_s5 = int_to_ptr.vmem [resolvable:$true] %s276_s5 }
   0xf   :  { %164 = vmatpush.bf16.msra.mxu2 %v371_v15  ;;  %v386_v50 = vld [vmem:[%s572_s7] ss:$0 sm:$0xff] }
  0x10   :  { %v260_v43 = vperm.slane %v35_v40, 0 }
  0x11   :  { %245 = vmatpush.bf16.msra.mxu3 %v379_v19 }
  0x13   :  { %165 = vmatpush.bf16.msra.mxu2 %v370_v16 }
  0x15   :  { %246 = vmatpush.bf16.msra.mxu3 %v378_v21 }
  0x17   :  { %166 = vmatpush.bf16.msra.mxu2 %v369_v18 }
  0x19   :  { %247 = vmatpush.bf16.msra.mxu3 %v377_v23 }
  0x1b   :  { %167 = vmatpush.bf16.msra.mxu2 %v368_v20 }
  0x1d   :  { %248 = vmatpush.bf16.msra.mxu3 %v376_v24 }
  0x1f   :  { %168 = vmatpush.bf16.msra.mxu2 %v367_v22 }
  0x21   :  { %249 = vmatpush.bf16.msra.mxu3 %v375_v25 }
  0x85   :  { %v72_v29 = vpop.f32.mrf.mxu0  ;;  %v85_v31 = vpop.f32.mrf.mxu1 }
  0x86   :  { %v73_v30 = vadd.f32 %v72_v29, %v45_v27  ;;  %v86_v32 = vadd.f32 %v85_v31, %v46_v28 }
  0x88   :  { %387 = vtanh.f32 %v73_v30  ;;  %v91_v33 = vmax.f32 %v86_v32, 0.0 }
  0x8a   :  { %v92_v34 = vpack.c.bf16 %v91_v33, %v91_v33 }
  0x8c   :  { %250 = vmatmul.bf16.vlgmr.msra.gmra.mxu3 %v92_v34 }
  0x8d   :  { %v74_v35 = vpop.f32.mrf.mxu0  ;;  %v87_v37 = vpop.f32.mrf.mxu1 }
  0x8e   :  { %v388_v36 = vpop.eup %387 }
  0x8f   :  { %v90_v38 = vpack.c.bf16 %v388_v36, %v388_v36 }
  0x91   :  { %169 = vmatmul.bf16.vlgmr.msra.gmra.mxu2 %v90_v38 }
 0x10f   :  { %v251_v41 = vpop.f32.mrf.mxu3 }
 0x110   :  { %v252_v52 = vadd.f32 %v386_v50, %v251_v41 }
 0x114   :  { %v170_v44 = vpop.f32.mrf.mxu2 }
 0x115   :  { %v171_v45 = vadd.f32 %v385_v42, %v170_v44 }
 0x117   :  { %v255_v46 = vmul.f32 1.442695, %v171_v45  ;;  %v265_v47 = vmul.f32 %v260_v43, %v171_v45  ;;  %v253_v48 = vpop.f32.mrf.mxu3 }
 0x119   :  { %389 = vpow2.f32 %v255_v46  ;;  %v266_v49 = vsel %vm59_vm0, %v265_v47, 0.0 }
 0x11a   :  { %267 = vadd.xlane.f32.xlu0 %v266_v49 }
 0x11c   :  { %v172_v51 = vpop.f32.mrf.mxu2 }
 0x11f   :  { %v390_v53 = vpop.eup %389 }
 0x120   :  { %v257_v54 = vmul.f32 %v390_v53, %v477_v2 }
 0x122   :  { %v258_v55 = vadd.f32 %v257_v54, %v252_v52 }
 0x124   :  { %v262_v56 = vmul.f32 %v260_v43, %v258_v55 }
 0x126   :  { %v263_v57 = vadd.f32 %v262_v56, %v492_v8 }
 0x128   :  { %264 = vst.msk [vmem:[#allocation2] sm:$0xff] %vm59_vm0, %v263_v57 }
 0x129   :  { %281 = dma.vmem_to_hbm [thread:$0]  %s277_s5, 128, %s279_s14, [#allocation3]  }
 0x18d   :  { %v268_v58 = vpop.xlane.xlu0 %267 }
 0x18e   :  { %270 = vst.msk [vmem:[%s574_s9] sm:$0xff] %vm269_vm1, %v268_v58 }
 0x18f   :  { %415 = dma.done.wait [#allocation3], 128  }
 0x190   :  { %416 = vsyncadd [#allocation3], 4294967168 }
 0x191   :  { %290 = vsyncpa [#allocation3], 1 }

</bundles_post_ra>
